<compile_context>
chip_gen: v7x
topology: tpu7x:2x2x1
jax: 0.10.0
libtpu: 0.0.40
codegen_flags: <defaults>
</compile_context>

<pallas_src>
import jax
import jax.numpy as jnp
from jax.experimental import pallas as pl
from jax.experimental.pallas import tpu as pltpu


def bcmlp_kernel(x_ref, w1_ref, b1_ref, w2_ref, b2_ref, w3_ref, b3_ref, out_ref):
    # x_ref: (tile_rows, n_dims*P) bf16 (P batch rows packed per lane-row)
    x = x_ref[...]

    # fc1 + relu  (bf16 MXU operands, f32 accumulate, f32 VPU bias/relu)
    h = jnp.dot(x, w1_ref[...], preferred_element_type=jnp.float32) + b1_ref[...]
    h = jnp.maximum(h, 0.0)

    # fc2 + relu
    h = jnp.dot(h.astype(w2_ref.dtype), w2_ref[...],
                preferred_element_type=jnp.float32) + b2_ref[...]
    h = jnp.maximum(h, 0.0)

    # fc3 with the [-1, +1] sign and concat folded into W3_aug = [-W3, W3]
    y = jnp.dot(h.astype(w3_ref.dtype), w3_ref[...],
                preferred_element_type=jnp.float32) + b3_ref[...]
    out_ref[...] = y.astype(out_ref.dtype)        # (tile_rows, 2*P)


def _default_pack_factor():
    """Row-packing factor: fill the MXU's K/N dims (128-wide -> 4, 256-wide -> 8)."""
    try:
        kind = jax.devices()[0].device_kind.lower()
    except Exception:
        return 8
    if any(v in kind for v in ("v2", "v3", "v4", "v5")):
        return 4
    return 8


def _blockdiag(w, p):
    """blockdiag(w, ..., w) with p copies on the diagonal: (fi, fo) -> (p*fi, p*fo)."""
    fi, fo = w.shape
    eye = jnp.eye(p, dtype=w.dtype)
    return (eye[:, None, :, None] * w[None, :, None, :]).reshape(p * fi, p * fo)


def bcmlp_forward(x, w1, b1, w2, b2, w3, b3, *, tile_b=8192, pack=None,
                  compute_dtype=jnp.bfloat16):
    B, n_dims = x.shape
    h1_dim = w1.shape[1]
    h2_dim = w2.shape[1]
    n_out = 2
    if pack is None:
        pack = _default_pack_factor()

    # ---- parameter prep (done once, outside the kernel; all tiny) ----------
    w3_aug = jnp.concatenate([-w3, w3], axis=1)               # (h2_dim, 2)
    b3_aug = jnp.concatenate([-b3, b3], axis=1)               # (1, 2)

    w1_blk = _blockdiag(w1, pack).astype(compute_dtype)       # (nd*P,  h1*P)
    w2_blk = _blockdiag(w2, pack).astype(compute_dtype)       # (h1*P,  h2*P)
    w3_blk = _blockdiag(w3_aug, pack).astype(compute_dtype)   # (h2*P,  2*P)
    b1_blk = jnp.tile(b1, (1, pack)).astype(jnp.float32)
    b2_blk = jnp.tile(b2, (1, pack)).astype(jnp.float32)
    b3_blk = jnp.tile(b3_aug, (1, pack)).astype(jnp.float32)

    # ---- pack P batch rows into the lane axis (free row-major reshape) -----
    Bp = pl.cdiv(B, pack) * pack
    if Bp != B:
        x = jnp.pad(x, ((0, Bp - B), (0, 0)))
    rows = Bp // pack
    xp = x.astype(compute_dtype).reshape(rows, n_dims * pack)

    # ---- batch tiling --------------------------------------------------------
    want = max(1, tile_b // pack)
    if rows >= 16:
        # keep >=2 grid steps so v7x's two TensorCores can split the batch axis
        want = min(want, max(8, ((rows + 1) // 2 // 8) * 8))
    if want >= rows:
        tile_rows = rows                        # single full-extent block (legal)
    else:
        tile_rows = max(8, (want // 8) * 8)     # sublane-aligned partial tiles
    grid = (pl.cdiv(rows, tile_rows),)

    def resident(a):
        # Whole-array block, same block every grid step -> stays VMEM-resident.
        return pl.BlockSpec(a.shape, lambda i: (0,) * a.ndim,
                            memory_space=pltpu.VMEM)

    weight_bytes = sum(int(a.size) * a.dtype.itemsize
                       for a in (w1_blk, b1_blk, w2_blk, b2_blk, w3_blk, b3_blk))
    cost = pl.CostEstimate(
        flops=2 * rows * pack * pack * (n_dims * h1_dim + h1_dim * h2_dim
                                        + h2_dim * n_out),
        bytes_accessed=(xp.size * xp.dtype.itemsize
                        + rows * n_out * pack * 4 + weight_bytes),
        transcendentals=0,
    )

    out_packed = pl.pallas_call(
        bcmlp_kernel,
        out_shape=jax.ShapeDtypeStruct((rows, n_out * pack), jnp.float32),
        grid=grid,
        in_specs=[
            pl.BlockSpec((tile_rows, n_dims * pack), lambda i: (i, 0),
                         memory_space=pltpu.VMEM),
            resident(w1_blk), resident(b1_blk),
            resident(w2_blk), resident(b2_blk),
            resident(w3_blk), resident(b3_blk),
        ],
        out_specs=pl.BlockSpec((tile_rows, n_out * pack), lambda i: (i, 0),
                               memory_space=pltpu.VMEM),
        compiler_params=pltpu.CompilerParams(
            dimension_semantics=("parallel",),
            vmem_limit_bytes=32 * 1024 * 1024),
        cost_estimate=cost,
    )(xp, w1_blk, b1_blk, w2_blk, b2_blk, w3_blk, b3_blk)

    # Unpack: each packed row holds P consecutive (y0, y1) pairs; drop padding.
    return out_packed.reshape(Bp, n_out)[:B]


def init_params(key, n_dims, n_units):
    """Deterministic init (uniform, like PyTorch's default Linear init)."""
    def linear(key, fan_in, fan_out):
        kw, kb = jax.random.split(key)
        bound = 1.0 / jnp.sqrt(fan_in)
        # weights stored already transposed: (fan_in, fan_out)
        w = jax.random.uniform(kw, (fan_in, fan_out), jnp.float32, -bound, bound)
        b = jax.random.uniform(kb, (1, fan_out), jnp.float32, -bound, bound)
        return w, b

    k1, k2, k3 = jax.random.split(key, 3)
    w1, b1 = linear(k1, n_dims, n_units[0])
    w2, b2 = linear(k2, n_units[0], n_units[1])
    w3, b3 = linear(k3, n_units[1], 1)
    return w1, b1, w2, b2, w3, b3


if __name__ == "__main__":
    n_dims = 32
    n_units = (32, 32)
    batch = 64

    key = jax.random.PRNGKey(0)
    kx, kp = jax.random.split(key)
    x = jax.random.normal(kx, (batch, n_dims), dtype=jnp.float32)
    params = init_params(kp, n_dims, n_units)

    out = bcmlp_forward(x, *params)
    out = jax.block_until_ready(out)
    assert out.shape == (batch, 2)

    w1, b1, w2, b2, w3, b3 = params

    # Reference 1: plain f32 math (exact PyTorch semantics) — loose tolerance
    # because the kernel uses bf16 MXU operands.
    h = jnp.maximum(x @ w1 + b1, 0.0)
    h = jnp.maximum(h @ w2 + b2, 0.0)
    y1 = h @ w3 + b3
    ref_f32 = jnp.concatenate([-y1, y1], axis=1)
    assert jnp.allclose(out, ref_f32, atol=1e-1, rtol=1e-1), (
        float(jnp.max(jnp.abs(out - ref_f32))))

    # Reference 2: same math with bf16 operands / f32 accumulation, mirroring
    # the kernel's numerics — tight tolerance.
    cd = jnp.bfloat16
    hb = jnp.maximum(jnp.dot(x.astype(cd), w1.astype(cd),
                             preferred_element_type=jnp.float32) + b1, 0.0)
    hb = jnp.maximum(jnp.dot(hb.astype(cd), w2.astype(cd),
                             preferred_element_type=jnp.float32) + b2, 0.0)
    y1b = jnp.dot(hb.astype(cd), w3.astype(cd),
                  preferred_element_type=jnp.float32) + b3
    ref_bf16 = jnp.concatenate([-y1b, y1b], axis=1)
    assert jnp.allclose(out, ref_bf16, atol=2e-3, rtol=2e-3), (
        float(jnp.max(jnp.abs(out - ref_bf16))))

    print("KERNEL_OK")
</pallas_src>

<mosaic_0001>
module attributes {stable_mosaic.version = 11 : i64} {
  func.func @bcmlp_kernel(%arg0: i32, %arg1: memref<8x256xbf16, #tpu.memory_space<vmem>>, %arg2: memref<256x256xbf16, #tpu.memory_space<vmem>>, %arg3: memref<1x256xf32, #tpu.memory_space<vmem>>, %arg4: memref<256x256xbf16, #tpu.memory_space<vmem>>, %arg5: memref<1x256xf32, #tpu.memory_space<vmem>>, %arg6: memref<256x16xbf16, #tpu.memory_space<vmem>>, %arg7: memref<1x16xf32, #tpu.memory_space<vmem>>, %arg8: memref<8x16xf32, #tpu.memory_space<vmem>>) attributes {dimension_semantics = [#tpu.dimension_semantics<parallel>], iteration_bounds = array<i64: 1>, scalar_prefetch = 0 : i64, scratch_operands = 0 : i64, tpu.core_type = #tpu.core_type<tc>, window_params = [{transform_indices = @transform_0, window_bounds = array<i64: 8, 256>}, {pipeline_mode = #tpu.pipeline_mode<synchronous>, transform_indices = @transform_1, window_bounds = array<i64: 256, 256>}, {pipeline_mode = #tpu.pipeline_mode<synchronous>, transform_indices = @transform_2, window_bounds = array<i64: 1, 256>}, {pipeline_mode = #tpu.pipeline_mode<synchronous>, transform_indices = @transform_3, window_bounds = array<i64: 256, 256>}, {pipeline_mode = #tpu.pipeline_mode<synchronous>, transform_indices = @transform_4, window_bounds = array<i64: 1, 256>}, {pipeline_mode = #tpu.pipeline_mode<synchronous>, transform_indices = @transform_5, window_bounds = array<i64: 256, 16>}, {pipeline_mode = #tpu.pipeline_mode<synchronous>, transform_indices = @transform_6, window_bounds = array<i64: 1, 16>}, {transform_indices = @transform_7, window_bounds = array<i64: 8, 16>}]} {
    %c0 = arith.constant 0 : index
    %c0_0 = arith.constant 0 : index
    %0 = vector.load %arg1[%c0, %c0_0] : memref<8x256xbf16, #tpu.memory_space<vmem>>, vector<8x256xbf16>
    %c0_1 = arith.constant 0 : index
    %c0_2 = arith.constant 0 : index
    %1 = vector.load %arg2[%c0_1, %c0_2] : memref<256x256xbf16, #tpu.memory_space<vmem>>, vector<256x256xbf16>
    %cst = arith.constant dense<0.000000e+00> : vector<8x256xf32>
    %2 = tpu.matmul %0, %1, %cst {dimension_numbers = #tpu.dot_dimension_numbers<[1], [0], [0], [1], [0, 0, 1, 1], [], []>} : vector<8x256xbf16>, vector<256x256xbf16>, vector<8x256xf32> -> vector<8x256xf32>
    %c0_3 = arith.constant 0 : index
    %c0_4 = arith.constant 0 : index
    %3 = vector.load %arg3[%c0_3, %c0_4] : memref<1x256xf32, #tpu.memory_space<vmem>>, vector<1x256xf32>
    %4 = vector.broadcast %3 : vector<1x256xf32> to vector<8x256xf32>
    %5 = arith.addf %2, %4 : vector<8x256xf32>
    %cst_5 = arith.constant 0.000000e+00 : f32
    %6 = vector.broadcast %cst_5 : f32 to vector<8x256xf32>
    %7 = arith.maximumf %5, %6 : vector<8x256xf32>
    %8 = arith.truncf %7 : vector<8x256xf32> to vector<8x256xbf16>
    %c0_6 = arith.constant 0 : index
    %c0_7 = arith.constant 0 : index
    %9 = vector.load %arg4[%c0_6, %c0_7] : memref<256x256xbf16, #tpu.memory_space<vmem>>, vector<256x256xbf16>
    %cst_8 = arith.constant dense<0.000000e+00> : vector<8x256xf32>
    %10 = tpu.matmul %8, %9, %cst_8 {dimension_numbers = #tpu.dot_dimension_numbers<[1], [0], [0], [1], [0, 0, 1, 1], [], []>} : vector<8x256xbf16>, vector<256x256xbf16>, vector<8x256xf32> -> vector<8x256xf32>
    %c0_9 = arith.constant 0 : index
    %c0_10 = arith.constant 0 : index
    %11 = vector.load %arg5[%c0_9, %c0_10] : memref<1x256xf32, #tpu.memory_space<vmem>>, vector<1x256xf32>
    %12 = vector.broadcast %11 : vector<1x256xf32> to vector<8x256xf32>
    %13 = arith.addf %10, %12 : vector<8x256xf32>
    %cst_11 = arith.constant 0.000000e+00 : f32
    %14 = vector.broadcast %cst_11 : f32 to vector<8x256xf32>
    %15 = arith.maximumf %13, %14 : vector<8x256xf32>
    %16 = arith.truncf %15 : vector<8x256xf32> to vector<8x256xbf16>
    %c0_12 = arith.constant 0 : index
    %c0_13 = arith.constant 0 : index
    %17 = vector.load %arg6[%c0_12, %c0_13] : memref<256x16xbf16, #tpu.memory_space<vmem>>, vector<256x16xbf16>
    %cst_14 = arith.constant dense<0.000000e+00> : vector<8x16xf32>
    %18 = tpu.matmul %16, %17, %cst_14 {dimension_numbers = #tpu.dot_dimension_numbers<[1], [0], [0], [1], [0, 0, 1, 1], [], []>} : vector<8x256xbf16>, vector<256x16xbf16>, vector<8x16xf32> -> vector<8x16xf32>
    %c0_15 = arith.constant 0 : index
    %c0_16 = arith.constant 0 : index
    %19 = vector.load %arg7[%c0_15, %c0_16] : memref<1x16xf32, #tpu.memory_space<vmem>>, vector<1x16xf32>
    %20 = vector.broadcast %19 : vector<1x16xf32> to vector<8x16xf32>
    %21 = arith.addf %18, %20 : vector<8x16xf32>
    %c0_17 = arith.constant 0 : index
    %c0_18 = arith.constant 0 : index
    %22 = vector.load %arg8[%c0_17, %c0_18] : memref<8x16xf32, #tpu.memory_space<vmem>>, vector<8x16xf32>
    tpu.vector_store %arg8[%c0_17, %c0_18], %21 {strides = array<i32>} : memref<8x16xf32, #tpu.memory_space<vmem>>, vector<8x16xf32>,
    return
  }
  func.func @transform_0(%arg0: i32) -> (i32, i32) {
    %c0_i32 = arith.constant 0 : i32
    %c0_i32_0 = arith.constant 0 : i32
    return %arg0, %c0_i32 : i32, i32
  }
  func.func @transform_1(%arg0: i32) -> (i32, i32) {
    %c0_i32 = arith.constant 0 : i32
    %c0_i32_0 = arith.constant 0 : i32
    %c0_i32_1 = arith.constant 0 : i32
    return %c0_i32, %c0_i32_0 : i32, i32
  }
  func.func @transform_2(%arg0: i32) -> (i32, i32) {
    %c0_i32 = arith.constant 0 : i32
    %c0_i32_0 = arith.constant 0 : i32
    %c0_i32_1 = arith.constant 0 : i32
    return %c0_i32, %c0_i32_0 : i32, i32
  }
  func.func @transform_3(%arg0: i32) -> (i32, i32) {
    %c0_i32 = arith.constant 0 : i32
    %c0_i32_0 = arith.constant 0 : i32
    %c0_i32_1 = arith.constant 0 : i32
    return %c0_i32, %c0_i32_0 : i32, i32
  }
  func.func @transform_4(%arg0: i32) -> (i32, i32) {
    %c0_i32 = arith.constant 0 : i32
    %c0_i32_0 = arith.constant 0 : i32
    %c0_i32_1 = arith.constant 0 : i32
    return %c0_i32, %c0_i32_0 : i32, i32
  }
  func.func @transform_5(%arg0: i32) -> (i32, i32) {
    %c0_i32 = arith.constant 0 : i32
    %c0_i32_0 = arith.constant 0 : i32
    %c0_i32_1 = arith.constant 0 : i32
    return %c0_i32, %c0_i32_0 : i32, i32
  }
  func.func @transform_6(%arg0: i32) -> (i32, i32) {
    %c0_i32 = arith.constant 0 : i32
    %c0_i32_0 = arith.constant 0 : i32
    %c0_i32_1 = arith.constant 0 : i32
    return %c0_i32, %c0_i32_0 : i32, i32
  }
  func.func @transform_7(%arg0: i32) -> (i32, i32) {
    %c0_i32 = arith.constant 0 : i32
    %c0_i32_0 = arith.constant 0 : i32
    return %arg0, %c0_i32 : i32, i32
  }
}

</mosaic_0001>

<bundles_post_ra>
// kernel: tpu_custom_call.1
= control target key start
LH: loop header
LB: loop body
LE: loop exit
PB: predicated region body
PF: predicated region fallthrough
CT: control target
= control target key end

     0   :  { %12 = vsyncpa [#allocation3], 0  ;;  %s1198_s0 = inlined_call_operand.vmem [shape: bf16[8,256], index: 0, kind: input, shape index: {}]   ;;  %s1199_s1 = inlined_call_operand.hbm [shape: bf16[256,256], index: 1, kind: input, shape index: {}]   ;;  %s1200_s2 = inlined_call_operand.vmem [shape: f32[1,256], index: 2, kind: input, shape index: {}]   ;;  %s1201_s3 = inlined_call_operand.hbm [shape: bf16[256,256], index: 3, kind: input, shape index: {}]   ;;  %s1202_s4 = inlined_call_operand.vmem [shape: f32[1,256], index: 4, kind: input, shape index: {}]   ;;  %s1203_s5 = inlined_call_operand.vmem [shape: bf16[256,16], index: 5, kind: input, shape index: {}]   ;;  %s1204_s6 = inlined_call_operand.vmem [shape: f32[1,16], index: 6, kind: input, shape index: {}]   ;;  %s1205_s7 = inlined_call_operand.hbm [shape: f32[8,16], index: 7, kind: output, shape index: {}]  }
   0x1   :  { %13 = vsyncpa [#allocation6], 0 }
   0x2   :  { %14 = vsyncpa [#allocation4], 0  ;;  %s1051_s24 = smov [#allocation2]   ;;  %s979_s28 = scalar_lea.hbm %s1199_s1, 4096 }
   0x3   :  { %s22_s25 = sshll.u32 %s1051_s24, 4  ;;  %p980_p0 = scmp.ne.s32.totalorder %s1199_s1, %s979_s28  ;;  %s23_s25 = int_to_ptr.vmem [resolvable:$true] %s22_s25 }
   0x4   :  { %p983_p1 = scmp.lt.u32.totalorder %s979_s28, %s1199_s1 }
   0x6   :  { %p985_p2 = pnand %p983_p1, %p980_p0 }
   0x8   :  { %988 = shalt.err (!%p985_p2)
}
   0x9   :  { %s989_s10 = scalar_lea.vmem %s23_s25, 4096  ;;  %p994_p4 = scmp.lt.s32.totalorder %s23_s25, %s23_s25 }
   0xa   :  { %p990_p3 = scmp.ne.s32.totalorder %s23_s25, %s989_s10  ;;  %p995_p5 = scmp.lt.s32.totalorder %s989_s10, %s989_s10 }
   0xc   :  { %p996_p6 = por %p995_p5, %p994_p4 }
   0xe   :  { %p997_p7 = pnand %p996_p6, %p990_p3 }
  0x10   :  { %1000 = shalt.err (!%p997_p7)
}
  0x11   :  { %s1052_s11 = smov 128   ;;  %s1053_s12 = smov 8  }
  0x12   :  { %28 = dma.hbm_to_vmem [thread:$0]  %s1199_s1, 4096, %s23_s25, [#allocation3], %s1052_s11, %s1052_s11, %s1053_s12  }
  0x13   :  { %s1054_s15 = smov [#allocation5]   ;;  %s1001_s19 = scalar_lea.hbm %s1201_s3, 4096 }
  0x14   :  { %s36_s16 = sshll.u32 %s1054_s15, 4  ;;  %p1002_p8 = scmp.ne.s32.totalorder %s1201_s3, %s1001_s19  ;;  %s37_s16 = int_to_ptr.vmem [resolvable:$true] %s36_s16 }
  0x15   :  { %p1005_p9 = scmp.lt.u32.totalorder %s1001_s19, %s1201_s3 }
  0x17   :  { %p1007_p10 = pnand %p1005_p9, %p1002_p8 }
  0x19   :  { %1010 = shalt.err (!%p1007_p10)
}
  0x1a   :  { %s1011_s24 = scalar_lea.vmem %s37_s16, 4096  ;;  %p1016_p12 = scmp.lt.s32.totalorder %s37_s16, %s37_s16 }
  0x1b   :  { %p1012_p11 = scmp.ne.s32.totalorder %s37_s16, %s1011_s24  ;;  %p1017_p13 = scmp.lt.s32.totalorder %s1011_s24, %s1011_s24 }
  0x1d   :  { %p1018_p0 = por %p1017_p13, %p1016_p12 }
  0x1f   :  { %p1019_p1 = pnand %p1018_p0, %p1012_p11 }
  0x21   :  { %1022 = shalt.err (!%p1019_p1)
}
  0x22   :  { %42 = dma.hbm_to_vmem [thread:$0]  %s1201_s3, 4096, %s37_s16, [#allocation6], %s1052_s11, %s1052_s11, %s1053_s12  }
  0x23   :  { %1045 = dma.done.wait [#allocation3], 4096  }
  0x24   :  { %1046 = vsyncadd [#allocation3], 4294963200 }
  0x25   :  { %1047 = dma.done.wait [#allocation6], 4096  }
  0x26   :  { %1048 = vsyncadd [#allocation6], 4294963200  ;;  %v865_v0 = vld [vmem:[#allocation2 + $0x4] ss:$8 sps:$4 sm:$0xff]   ;;  %v867_v1 = vld [vmem:[#allocation2] ss:$8 sps:$4 sm:$0xff]  }
  0x27   :  { %268 = vmatprep.subr.bf16.mxu0 %v865_v0  ;;  %v868_v2 = vld [vmem:[#allocation2 + $0x14] ss:$8 sps:$4 sm:$0xff]   ;;  %v870_v3 = vld [vmem:[#allocation2 + $0x10] ss:$8 sps:$4 sm:$0xff]   ;;  %v871_v4 = vld [vmem:[#allocation2 + $0x24] ss:$8 sps:$4 sm:$0xff]  }
  0x28   :  { %269 = vmatpush1.bf16.msra.mxu0 %v867_v1  ;;  %v873_v5 = vld [vmem:[#allocation2 + $0x20] ss:$8 sps:$4 sm:$0xff]   ;;  %v874_v6 = vld [vmem:[#allocation2 + $0x34] ss:$8 sps:$4 sm:$0xff]   ;;  %v876_v7 = vld [vmem:[#allocation2 + $0x30] ss:$8 sps:$4 sm:$0xff]  }
  0x29   :  { %270 = vmatprep.subr.bf16.mxu0 %v868_v2  ;;  %v877_v8 = vld [vmem:[#allocation2 + $0x44] ss:$8 sps:$4 sm:$0xff]   ;;  %v879_v9 = vld [vmem:[#allocation2 + $0x40] ss:$8 sps:$4 sm:$0xff]   ;;  %v880_v10 = vld [vmem:[#allocation2 + $0x54] ss:$8 sps:$4 sm:$0xff]  }
  0x2a   :  { %v882_v11 = vld [vmem:[#allocation2 + $0x50] ss:$8 sps:$4 sm:$0xff]   ;;  %v883_v12 = vld [vmem:[#allocation2 + $0x64] ss:$8 sps:$4 sm:$0xff]   ;;  %v885_v13 = vld [vmem:[#allocation2 + $0x60] ss:$8 sps:$4 sm:$0xff]  }
  0x2b   :  { %v1123_v14 = vld [vmem:[%s1198_s0] sm:$0xff]  ;;  %v918_v18 = vld [vmem:[#allocation5 + $0x14] ss:$8 sps:$4 sm:$0xff]   ;;  %v888_v20 = vld [vmem:[#allocation2 + $0x70] ss:$8 sps:$4 sm:$0xff]   ;;  %vm737_vm0 = vcmask 130048  }
  0x2c   :  { %271 = vmatpush1.bf16.msra.mxu0 %v870_v3  ;;  %v756_v15 = vcombine.high %v1123_v14, %v1123_v14  ;;  %v915_v16 = vld [vmem:[#allocation5 + $0x4] ss:$8 sps:$4 sm:$0xff]   ;;  %v917_v17 = vld [vmem:[#allocation5] ss:$8 sps:$4 sm:$0xff]   ;;  %v886_v19 = vld [vmem:[#allocation2 + $0x74] ss:$8 sps:$4 sm:$0xff]   ;;  %v755_v55 = vcombine.low %v1123_v14, %v1123_v14 }
  0x2d   :  { %272 = vmatprep.subr.bf16.mxu0 %v871_v4  ;;  %517 = vmatprep.subr.bf16.mxu1 %v915_v16  ;;  %v920_v21 = vld [vmem:[#allocation5 + $0x10] ss:$8 sps:$4 sm:$0xff]   ;;  %v921_v22 = vld [vmem:[#allocation5 + $0x24] ss:$8 sps:$4 sm:$0xff]   ;;  %v891_v24 = vld [vmem:[#allocation2 + $0x80] ss:$8 sps:$4 sm:$0xff]  }
  0x2e   :  { %300 = vmatprep.mubr.bf16.mxu0 %v756_v15  ;;  %518 = vmatpush1.bf16.msra.mxu1 %v917_v17  ;;  %v889_v23 = vld [vmem:[#allocation2 + $0x84] ss:$8 sps:$4 sm:$0xff]   ;;  %v923_v25 = vld [vmem:[#allocation5 + $0x20] ss:$8 sps:$4 sm:$0xff]   ;;  %v924_v26 = vld [vmem:[#allocation5 + $0x34] ss:$8 sps:$4 sm:$0xff]   ;;  %v91_v15 = vlaneseq }
  0x2f   :  { %519 = vmatprep.subr.bf16.mxu1 %v918_v18  ;;  %v892_v27 = vld [vmem:[#allocation2 + $0x94] ss:$8 sps:$4 sm:$0xff]   ;;  %v894_v28 = vld [vmem:[#allocation2 + $0x90] ss:$8 sps:$4 sm:$0xff]   ;;  %v927_v30 = vld [vmem:[#allocation5 + $0x44] ss:$8 sps:$4 sm:$0xff]  }
  0x30   :  { %273 = vmatpush1.bf16.msra.mxu0 %v873_v5  ;;  %v926_v29 = vld [vmem:[#allocation5 + $0x30] ss:$8 sps:$4 sm:$0xff]   ;;  %v895_v31 = vld [vmem:[#allocation2 + $0xa4] ss:$8 sps:$4 sm:$0xff]   ;;  %v897_v32 = vld [vmem:[#allocation2 + $0xa0] ss:$8 sps:$4 sm:$0xff]  }
  0x31   :  { %274 = vmatprep.subr.bf16.mxu0 %v874_v6  ;;  %v929_v33 = vld [vmem:[#allocation5 + $0x40] ss:$8 sps:$4 sm:$0xff]   ;;  %v930_v34 = vld [vmem:[#allocation5 + $0x54] ss:$8 sps:$4 sm:$0xff]   ;;  %v932_v36 = vld [vmem:[#allocation5 + $0x50] ss:$8 sps:$4 sm:$0xff]  }
  0x32   :  { %520 = vmatpush1.bf16.msra.mxu1 %v920_v21  ;;  %v898_v35 = vld [vmem:[#allocation2 + $0xb4] ss:$8 sps:$4 sm:$0xff]   ;;  %v900_v37 = vld [vmem:[#allocation2 + $0xb0] ss:$8 sps:$4 sm:$0xff]   ;;  %v933_v38 = vld [vmem:[#allocation5 + $0x64] ss:$8 sps:$4 sm:$0xff]  }
  0x33   :  { %521 = vmatprep.subr.bf16.mxu1 %v921_v22  ;;  %v901_v39 = vld [vmem:[#allocation2 + $0xc4] ss:$8 sps:$4 sm:$0xff]   ;;  %v935_v40 = vld [vmem:[#allocation5 + $0x60] ss:$8 sps:$4 sm:$0xff]   ;;  %v936_v42 = vld [vmem:[#allocation5 + $0x74] ss:$8 sps:$4 sm:$0xff]  }
  0x34   :  { %275 = vmatpush1.bf16.msra.mxu0 %v876_v7  ;;  %v903_v41 = vld [vmem:[#allocation2 + $0xc0] ss:$8 sps:$4 sm:$0xff]   ;;  %v904_v43 = vld [vmem:[#allocation2 + $0xd4] ss:$8 sps:$4 sm:$0xff]   ;;  %v938_v44 = vld [vmem:[#allocation5 + $0x70] ss:$8 sps:$4 sm:$0xff]  }
  0x35   :  { %276 = vmatprep.subr.bf16.mxu0 %v877_v8  ;;  %v906_v45 = vld [vmem:[#allocation2 + $0xd0] ss:$8 sps:$4 sm:$0xff]   ;;  %v939_v46 = vld [vmem:[#allocation5 + $0x84] ss:$8 sps:$4 sm:$0xff]   ;;  %v941_v48 = vld [vmem:[#allocation5 + $0x80] ss:$8 sps:$4 sm:$0xff]  }
  0x36   :  { %522 = vmatpush1.bf16.msra.mxu1 %v923_v25  ;;  %v907_v47 = vld [vmem:[#allocation2 + $0xe4] ss:$8 sps:$4 sm:$0xff]   ;;  %v909_v49 = vld [vmem:[#allocation2 + $0xe0] ss:$8 sps:$4 sm:$0xff]   ;;  %v942_v50 = vld [vmem:[#allocation5 + $0x94] ss:$8 sps:$4 sm:$0xff]  }
  0x37   :  { %523 = vmatprep.subr.bf16.mxu1 %v924_v26  ;;  %v910_v51 = vld [vmem:[#allocation2 + $0xf4] ss:$8 sps:$4 sm:$0xff]   ;;  %v944_v52 = vld [vmem:[#allocation5 + $0x90] ss:$8 sps:$4 sm:$0xff]   ;;  %v945_v54 = vld [vmem:[#allocation5 + $0xa4] ss:$8 sps:$4 sm:$0xff]  }
  0x38   :  { %277 = vmatpush1.bf16.msra.mxu0 %v879_v9  ;;  %v912_v53 = vld [vmem:[#allocation2 + $0xf0] ss:$8 sps:$4 sm:$0xff]   ;;  %v947_v56 = vld [vmem:[#allocation5 + $0xa0] ss:$8 sps:$4 sm:$0xff]   ;;  %v948_v57 = vld [vmem:[#allocation5 + $0xb4] ss:$8 sps:$4 sm:$0xff]  }
  0x39   :  { %278 = vmatprep.subr.bf16.mxu0 %v880_v10  ;;  %v950_v58 = vld [vmem:[#allocation5 + $0xb0] ss:$8 sps:$4 sm:$0xff]   ;;  %v951_v59 = vld [vmem:[#allocation5 + $0xc4] ss:$8 sps:$4 sm:$0xff]   ;;  %v953_v60 = vld [vmem:[#allocation5 + $0xc0] ss:$8 sps:$4 sm:$0xff]  }
  0x3a   :  { %524 = vmatpush1.bf16.msra.mxu1 %v926_v29  ;;  %v954_v61 = vld [vmem:[#allocation5 + $0xd4] ss:$8 sps:$4 sm:$0xff]   ;;  %v956_v62 = vld [vmem:[#allocation5 + $0xd0] ss:$8 sps:$4 sm:$0xff]   ;;  %v957_v63 = vld [vmem:[#allocation5 + $0xe4] ss:$8 sps:$4 sm:$0xff]  }
  0x3b   :  { %525 = vmatprep.subr.bf16.mxu1 %v927_v30  ;;  %v959_v0 = vld [vmem:[#allocation5 + $0xe0] ss:$8 sps:$4 sm:$0xff]   ;;  %v960_v1 = vld [vmem:[#allocation5 + $0xf4] ss:$8 sps:$4 sm:$0xff]   ;;  %v962_v2 = vld [vmem:[#allocation5 + $0xf0] ss:$8 sps:$4 sm:$0xff]  }
  0x3c   :  { %279 = vmatpush1.bf16.msra.mxu0 %v882_v11  ;;  %v963_v3 = vld [vmem:[%s1203_s5 + $0x40] sm:$0xff]   ;;  %v965_v5 = vld [vmem:[%s1203_s5 + $0x48] sm:$0xff]   ;;  %v967_v7 = vld [vmem:[%s1203_s5 + $0x50] sm:$0xff]   ;;  %v92_v16 = vshrl.u32 %v91_v15, 7 }
  0x3d   :  { %280 = vmatprep.subr.bf16.mxu0 %v883_v12  ;;  %v964_v4 = vld [vmem:[%s1203_s5] sm:$0xff]   ;;  %v966_v6 = vld [vmem:[%s1203_s5 + $0x8] sm:$0xff]   ;;  %v968_v8 = vld [vmem:[%s1203_s5 + $0x10] sm:$0xff]  }
  0x3e   :  { %526 = vmatpush1.bf16.msra.mxu1 %v929_v33  ;;  %v969_v9 = vld [vmem:[%s1203_s5 + $0x58] sm:$0xff]   ;;  %v971_v11 = vld [vmem:[%s1203_s5 + $0x60] sm:$0xff]   ;;  %v974_v14 = vld [vmem:[%s1203_s5 + $0x28] sm:$0xff]   ;;  %v93_v17 = vsub.s32 0, %v92_v16 }
  0x3f   :  { %527 = vmatprep.subr.bf16.mxu1 %v930_v34  ;;  %v970_v10 = vld [vmem:[%s1203_s5 + $0x18] sm:$0xff]   ;;  %v972_v12 = vld [vmem:[%s1203_s5 + $0x20] sm:$0xff]   ;;  %v976_v33 = vld [vmem:[%s1203_s5 + $0x30] sm:$0xff]  }
  0x40   :  { %281 = vmatpush1.bf16.msra.mxu0 %v885_v13  ;;  %v973_v13 = vld [vmem:[%s1203_s5 + $0x68] sm:$0xff]   ;;  %v89_v18 = vld [vmem:[%s1200_s2] sm:$0x3]  ;;  %v977_v34 = vld [vmem:[%s1203_s5 + $0x78] sm:$0xff]  }
  0x41   :  { %282 = vmatprep.subr.bf16.mxu0 %v886_v19  ;;  %v97_v19 = vsub.s32 1, %v92_v16 }
  0x42   :  { %528 = vmatpush1.bf16.msra.mxu1 %v932_v36  ;;  %v345_v36 = vld [vmem:[%s1202_s4] sm:$0x3]  ;;  %s1055_s4 = smov [#allocation7]  }
  0x43   :  { %529 = vmatprep.subr.bf16.mxu1 %v933_v38  ;;  %v98_v21 = vrot.slane %v89_v18, %v97_v19  ;;  %v354_v38 = vrot.slane %v345_v36, %v97_v19  ;;  %s745_s13 = sshll.u32 %s1055_s4, 4  ;;  %s746_s13 = int_to_ptr.vmem [resolvable:$true] %s745_s13 }
  0x44   :  { %283 = vmatpush1.bf16.msra.mxu0 %v888_v20  ;;  %v94_v20 = vrot.slane %v89_v18, %v93_v17  ;;  %s1023_s14 = scalar_lea.vmem %s746_s13, 128  ;;  %p1028_p3 = scmp.lt.s32.totalorder %s746_s13, %s746_s13 }
  0x45   :  { %284 = vmatprep.subr.bf16.mxu0 %v889_v23  ;;  %p1024_p2 = scmp.ne.s32.totalorder %s746_s13, %s1023_s14  ;;  %p1029_p4 = scmp.lt.s32.totalorder %s1023_s14, %s1023_s14 }
  0x46   :  { %530 = vmatpush1.bf16.msra.mxu1 %v935_v40 }
  0x47   :  { %531 = vmatprep.subr.bf16.mxu1 %v936_v42  ;;  %p1030_p5 = por %p1029_p4, %p1028_p3 }
  0x48   :  { %285 = vmatpush1.bf16.msra.mxu0 %v891_v24 }
  0x49   :  { %286 = vmatprep.subr.bf16.mxu0 %v892_v27  ;;  %p1031_p6 = pnand %p1030_p5, %p1024_p2 }
  0x4a   :  { %532 = vmatpush1.bf16.msra.mxu1 %v938_v44 }
  0x4b   :  { %533 = vmatprep.subr.bf16.mxu1 %v939_v46 }
  0x4c   :  { %287 = vmatpush1.bf16.msra.mxu0 %v894_v28 }
  0x4d   :  { %288 = vmatprep.subr.bf16.mxu0 %v895_v31 }
  0x4e   :  { %534 = vmatpush1.bf16.msra.mxu1 %v941_v48 }
  0x4f   :  { %535 = vmatprep.subr.bf16.mxu1 %v942_v50  ;;  %v821_v50 = vld [vmem:[%s1204_s6] ss:$0 sm:$0xff] }
  0x50   :  { %289 = vmatpush1.bf16.msra.mxu0 %v897_v32  ;;  %v975_v32 = vld [vmem:[%s1203_s5 + $0x70] sm:$0xff]  }
  0x51   :  { %290 = vmatprep.subr.bf16.mxu0 %v898_v35  ;;  %v978_v35 = vld [vmem:[%s1203_s5 + $0x38] sm:$0xff]  }
  0x52   :  { %536 = vmatpush1.bf16.msra.mxu1 %v944_v52 }
  0x53   :  { %537 = vmatprep.subr.bf16.mxu1 %v945_v54 }
  0x54   :  { %291 = vmatpush1.bf16.msra.mxu0 %v900_v37  ;;  %v350_v37 = vrot.slane %v345_v36, %v93_v17 }
  0x55   :  { %292 = vmatprep.subr.bf16.mxu0 %v901_v39 }
  0x56   :  { %538 = vmatpush1.bf16.msra.mxu1 %v947_v56 }
  0x57   :  { %539 = vmatprep.subr.bf16.mxu1 %v948_v57 }
  0x58   :  { %293 = vmatpush1.bf16.msra.mxu0 %v903_v41 }
  0x59   :  { %294 = vmatprep.subr.bf16.mxu0 %v904_v43 }
  0x5a   :  { %540 = vmatpush1.bf16.msra.mxu1 %v950_v58 }
  0x5b   :  { %541 = vmatprep.subr.bf16.mxu1 %v951_v59 }
  0x5c   :  { %295 = vmatpush1.bf16.msra.mxu0 %v906_v45 }
  0x5d   :  { %296 = vmatprep.subr.bf16.mxu0 %v907_v47 }
  0x5e   :  { %542 = vmatpush1.bf16.msra.mxu1 %v953_v60 }
  0x5f   :  { %543 = vmatprep.subr.bf16.mxu1 %v954_v61 }
  0x60   :  { %297 = vmatpush1.bf16.msra.mxu0 %v909_v49 }
  0x61   :  { %298 = vmatprep.subr.bf16.mxu0 %v910_v51 }
  0x62   :  { %544 = vmatpush1.bf16.msra.mxu1 %v956_v62 }
  0x63   :  { %545 = vmatprep.subr.bf16.mxu1 %v957_v63 }
  0x64   :  { %299 = vmatpush1.bf16.msra.mxu0 %v912_v53 }
  0x65   :  { %838 = vmatprep.subr.bf16.mxu0 %v963_v3 }
  0x66   :  { %546 = vmatpush1.bf16.msra.mxu1 %v959_v0 }
  0x67   :  { %301 = vmatmul.mubr.bf16.vlgmr.msra.gmra.mrb[0].mxu0 %v755_v55  ;;  %547 = vmatprep.subr.bf16.mxu1 %v960_v1 }
  0x68   :  { %839 = vmatpush3.bf16.msra.mxu0 %v964_v4 }
  0x69   :  { %840 = vmatprep.subr.bf16.mxu0 %v965_v5 }
  0x6a   :  { %548 = vmatpush1.bf16.msra.mxu1 %v962_v2 }
  0x6c   :  { %841 = vmatpush3.bf16.msra.mxu0 %v966_v6 }
  0x6d   :  { %842 = vmatprep.subr.bf16.mxu0 %v967_v7 }
  0x70   :  { %843 = vmatpush3.bf16.msra.mxu0 %v968_v8 }
  0x71   :  { %844 = vmatprep.subr.bf16.mxu0 %v969_v9 }
  0x74   :  { %845 = vmatpush3.bf16.msra.mxu0 %v970_v10 }
  0x75   :  { %846 = vmatprep.subr.bf16.mxu0 %v971_v11 }
  0x78   :  { %847 = vmatpush3.bf16.msra.mxu0 %v972_v12 }
  0x79   :  { %848 = vmatprep.subr.bf16.mxu0 %v973_v13 }
  0x7c   :  { %849 = vmatpush3.bf16.msra.mxu0 %v974_v14 }
  0x7d   :  { %850 = vmatprep.subr.bf16.mxu0 %v975_v32 }
  0x80   :  { %851 = vmatpush3.bf16.msra.mxu0 %v976_v33 }
  0x81   :  { %852 = vmatprep.subr.bf16.mxu0 %v977_v34 }
  0x84   :  { %853 = vmatpush3.bf16.msra.mxu0 %v978_v35 }
 0x13a   :  { %v302_v22 = vpop.f32.mrb[0].mxu0 }
 0x13b   :  { %v303_v23 = vadd.f32 %v302_v22, %v94_v20  ;;  %v304_v24 = vpop.f32.mrb[1].mxu0 }
 0x13c   :  { %v305_v25 = vadd.f32 %v304_v24, %v98_v21  ;;  %v306_v26 = vpop.f32.mrb[2].mxu0 }
 0x13d   :  { %v309_v27 = vmax.f32 %v303_v23, 0.0  ;;  %v307_v28 = vpop.f32.mrb[3].mxu0 }
 0x13e   :  { %v310_v29 = vmax.f32 %v305_v25, 0.0 }
 0x13f   :  { %v311_v31 = vpack.c.bf16 %v309_v27, %v309_v27 }
 0x140   :  { %v312_v30 = vpack.c.bf16 %v310_v29, %v310_v29 }
 0x142   :  { %549 = vmatprep.mubr.bf16.mxu1 %v312_v30 }
 0x143   :  { %550 = vmatmul.mubr.bf16.vlgmr.msra.gmra.mrb[0].mxu1 %v311_v31 }
 0x216   :  { %v551_v39 = vpop.f32.mrb[0].mxu1 }
 0x217   :  { %v552_v40 = vadd.f32 %v551_v39, %v350_v37  ;;  %v553_v41 = vpop.f32.mrb[1].mxu1 }
 0x218   :  { %v554_v42 = vadd.f32 %v553_v41, %v354_v38  ;;  %v555_v43 = vpop.f32.mrb[2].mxu1 }
 0x219   :  { %v558_v44 = vmax.f32 %v552_v40, 0.0  ;;  %v556_v45 = vpop.f32.mrb[3].mxu1 }
 0x21a   :  { %v559_v46 = vmax.f32 %v554_v42, 0.0 }
 0x21b   :  { %v560_v48 = vpack.c.bf16 %v558_v44, %v558_v44 }
 0x21c   :  { %v561_v47 = vpack.c.bf16 %v559_v46, %v559_v46 }
 0x21e   :  { %729 = vmatprep.mubr.bf16.mxu0 %v561_v47 }
 0x21f   :  { %730 = vmatmul.mubr.bf16.vlgmr.msra.gmra.mrb[4].mxu0 %v560_v48 }
 0x2f2   :  { %v854_v49 = vpop.f32.mrb[4].mxu0 }
 0x2f3   :  { %v855_v51 = vpop.f32.mrb[5].mxu0 }
 0x2f4   :  { %v856_v52 = vadd.f32 %v855_v51, %v854_v49  ;;  %v857_v53 = vpop.f32.mrb[6].mxu0 }
 0x2f5   :  { %v858_v54 = vpop.f32.mrb[7].mxu0 }
 0x2f6   :  { %v732_v55 = vadd.f32 %v856_v52, %v821_v50 }
 0x2f8   :  { %738 = vst.msk [vmem:[#allocation7] sm:$0xff] %vm737_vm0, %v732_v55 }
 0x2f9   :  { %1034 = shalt.err (!%p1031_p6)
}
 0x2fa   :  { %s1035_s6 = scalar_lea.hbm %s1205_s7, 128 }
 0x2fb   :  { %p1036_p7 = scmp.ne.s32.totalorder %s1205_s7, %s1035_s6  ;;  %p1039_p8 = scmp.lt.u32.totalorder %s1035_s6, %s1205_s7 }
 0x2fd   :  { %p1041_p9 = pnand %p1039_p8, %p1036_p7 }
 0x2ff   :  { %1044 = shalt.err (!%p1041_p9)
}
 0x300   :  { %748 = dma.vmem_to_hbm [thread:$0]  %s746_s13, 128, %s1205_s7, [#allocation4]  }
 0x301   :  { %1049 = dma.done.wait [#allocation4], 128  }
 0x302   :  { %1050 = vsyncadd [#allocation4], 4294967168 }
 0x303   :  { %752 = vsyncpa [#allocation3], 1 }
 0x304   :  { %753 = vsyncpa [#allocation6], 1 }
 0x305   :  { %754 = vsyncpa [#allocation4], 1 }

</bundles_post_ra>
